<compile_context>
chip_gen: v7x
topology: tpu7x:2x2x1
jax: 0.10.0
libtpu: 0.0.40
codegen_flags: <defaults>
</compile_context>

<pallas_src>
import functools

import jax
import jax.numpy as jnp
from jax.experimental import pallas as pl
from jax.experimental.pallas import tpu as pltpu


def _round_up(x, m):
    return ((x + m - 1) // m) * m


@functools.lru_cache(maxsize=1)
def _vmem_budget_bytes():
    """Per-kernel VMEM limit: ~3/4 of physical VMEM, capped at 100 MiB.
    (v5e/v6e: 128 MiB -> 96 MiB; v7x: 64 MiB -> 48 MiB.)"""
    cap = 64 * 1024 * 1024  # conservative fallback (v7x-sized)
    try:
        cap = int(pltpu.get_tpu_info().vmem_capacity_bytes)
    except Exception:
        pass
    return min((cap * 3) // 4, 100 * 1024 * 1024)


# ---------------------------------------------------------------------------
# Kernels
# ---------------------------------------------------------------------------
def _encoder_resident_kernel(x_ref, w1_ref, b1_ref, w2_ref, b2_ref, o_ref):
    """Weights fully resident in VMEM; one fused fc1 -> ReLU -> fc2 per batch
    tile.  Grid: (batch tiles,) marked "parallel"."""
    h = jnp.dot(x_ref[...], w1_ref[...], preferred_element_type=jnp.float32)
    h = jnp.maximum(h + b1_ref[...], 0.0)
    y = jnp.dot(h.astype(w2_ref.dtype), w2_ref[...],
                preferred_element_type=jnp.float32)
    o_ref[...] = (y + b2_ref[...]).astype(o_ref.dtype)


def _encoder_streaming_kernel(x_ref, w1_ref, b1_ref, w2_ref, b2_ref,
                              o_ref, acc_ref):
    """Hidden dim streamed in chunks of tk along a trailing reduction axis.
    Grid: (batch tiles "parallel", hidden chunks "arbitrary")."""
    k = pl.program_id(1)

    @pl.when(k == 0)
    def _init():
        # Seed the accumulator with b2 so finalize is just a cast + store.
        acc_ref[...] = jnp.broadcast_to(b2_ref[...], acc_ref.shape)

    h = jnp.dot(x_ref[...], w1_ref[...], preferred_element_type=jnp.float32)
    h = jnp.maximum(h + b1_ref[...], 0.0)
    acc_ref[...] += jnp.dot(h.astype(w2_ref.dtype), w2_ref[...],
                            preferred_element_type=jnp.float32)

    @pl.when(k == pl.num_programs(1) - 1)
    def _finalize():
        o_ref[...] = acc_ref[...].astype(o_ref.dtype)


# ---------------------------------------------------------------------------
# Trace-time planning
# ---------------------------------------------------------------------------
def _plan_tiles(B, Ipad, Hpad, Lpad, out_itemsize, tb_req, budget):
    """Static tiling decisions.  Returns (tb, tk, resident)."""
    BF16 = 2
    # Batch tile: default 256 (fills the 256-row MXU on v6e/v7x); multiple of
    # 16 for bf16 sublane packing.  Keep >= 2 batch tiles when the batch is
    # large enough so v7x's two TensorCores both get work.
    tb = min(tb_req, _round_up(B, 16))
    if _round_up(B, tb) // tb < 2 and B >= 256:
        tb = _round_up((B + 1) // 2, 16)

    def fits(nbytes):
        return nbytes <= (budget * 9) // 10  # headroom for internal scratch

    # Resident plan: whole W1/W2 live in VMEM across all batch tiles
    # (conservatively budgeted as double-buffered even though their block
    # index never changes).
    resident_bytes = (
        2 * (Ipad * Hpad + Hpad * Lpad) * BF16   # W1, W2
        + 2 * tb * Ipad * BF16                   # x tile (double-buffered)
        + 2 * tb * Lpad * out_itemsize           # out tile
        + tb * Hpad * 4                          # f32 hidden intermediate
        + 2 * 8 * (Hpad + Lpad) * 4)             # biases (sublane-padded)
    if fits(resident_bytes):
        return tb, Hpad, True

    # Streaming plan: pick the largest hidden chunk tk that divides Hpad
    # (itself a multiple of 128) and fits the budget; prefer multiples of 256
    # (full-width weight pushes on the v6e/v7x MXU), 128 always divides.
    # TODO(synk): add pipeline_mode=pl.Buffered(3) on W1/W2 if profiling shows
    # exposed DMA on the streaming path.
    for tk in (1024, 768, 512, 384, 256, 128):
        if Hpad % tk:
            continue
        stream_bytes = (
            2 * Ipad * tk * BF16 + 2 * tk * Lpad * BF16   # W1/W2 chunks
            + 2 * tb * Ipad * BF16                        # x tile
            + 2 * tb * Lpad * out_itemsize                # out tile
            + tb * Lpad * 4                               # f32 accumulator
            + tb * tk * 4                                 # f32 hidden chunk
            + 2 * 8 * (tk + Lpad) * 4)                    # biases
        if fits(stream_bytes):
            return tb, tk, False
    return tb, 128, False


# ---------------------------------------------------------------------------
# Wrappers
# ---------------------------------------------------------------------------
def prepare_params(w1, b1, w2, b2, *, compute_dtype=jnp.bfloat16):
    """Pad feature dims to multiples of 128 and cast to the MXU compute dtype
    ONCE (outside the per-call forward).  Weights are stored pre-transposed
    relative to PyTorch: (in_features, out_features).  Zero padding cannot
    change the matmul results for the real rows/cols."""
    input_dim, hidden_dim = w1.shape
    latent_dim = w2.shape[1]
    Ipad = _round_up(input_dim, 128)
    Hpad = _round_up(hidden_dim, 128)
    Lpad = _round_up(latent_dim, 128)
    w1_p = jnp.zeros((Ipad, Hpad), compute_dtype).at[:input_dim, :hidden_dim].set(
        w1.astype(compute_dtype))
    b1_p = jnp.zeros((1, Hpad), jnp.float32).at[:, :hidden_dim].set(
        b1.reshape(1, hidden_dim).astype(jnp.float32))
    w2_p = jnp.zeros((Hpad, Lpad), compute_dtype).at[:hidden_dim, :latent_dim].set(
        w2.astype(compute_dtype))
    b2_p = jnp.zeros((1, Lpad), jnp.float32).at[:, :latent_dim].set(
        b2.reshape(1, latent_dim).astype(jnp.float32))
    return (w1_p, b1_p, w2_p, b2_p), (input_dim, hidden_dim, latent_dim)


@functools.partial(jax.jit, static_argnames=("dims", "tb_req"))
def encoder_forward(x, w1_p, b1_p, w2_p, b2_p, *, dims, tb_req=256):
    """x: (B, input_dim) float; padded params from prepare_params.
    Returns (B, latent_dim) in x.dtype."""
    input_dim, hidden_dim, latent_dim = dims
    B = x.shape[0]
    compute_dtype = w1_p.dtype
    out_dtype = x.dtype
    Ipad, Hpad = w1_p.shape
    Lpad = w2_p.shape[1]

    budget = _vmem_budget_bytes()
    tb, tk, resident = _plan_tiles(B, Ipad, Hpad, Lpad,
                                   jnp.dtype(out_dtype).itemsize,
                                   tb_req, budget)
    Bpad = _round_up(B, tb)
    nb, nk = Bpad // tb, Hpad // tk

    # Pad/cast x only when actually needed (zero rows/cols contribute nothing).
    if x.shape == (Bpad, Ipad) and x.dtype == compute_dtype:
        x_p = x
    else:
        x_p = jnp.zeros((Bpad, Ipad), compute_dtype).at[:B, :input_dim].set(
            x.astype(compute_dtype))

    itemsize = jnp.dtype(compute_dtype).itemsize
    weight_reads = 1 if resident else nb     # streaming re-reads per batch tile
    flops = 2 * Bpad * (Ipad * Hpad + Hpad * Lpad)
    bytes_accessed = (
        Bpad * Ipad * itemsize
        + weight_reads * (Ipad * Hpad + Hpad * Lpad) * itemsize
        + (Hpad + Lpad) * 4
        + Bpad * Lpad * jnp.dtype(out_dtype).itemsize)
    cost = pl.CostEstimate(flops=flops, transcendentals=0,
                           bytes_accessed=bytes_accessed)

    if resident:
        out = pl.pallas_call(
            _encoder_resident_kernel,
            out_shape=jax.ShapeDtypeStruct((Bpad, Lpad), out_dtype),
            grid_spec=pltpu.PrefetchScalarGridSpec(
                num_scalar_prefetch=0,
                grid=(nb,),
                in_specs=[
                    pl.BlockSpec((tb, Ipad), lambda i: (i, 0)),     # x tile
                    pl.BlockSpec((Ipad, Hpad), lambda i: (0, 0)),   # W1 resident
                    pl.BlockSpec((1, Hpad), lambda i: (0, 0)),      # b1 resident
                    pl.BlockSpec((Hpad, Lpad), lambda i: (0, 0)),   # W2 resident
                    pl.BlockSpec((1, Lpad), lambda i: (0, 0)),      # b2 resident
                ],
                out_specs=pl.BlockSpec((tb, Lpad), lambda i: (i, 0)),
            ),
            compiler_params=pltpu.CompilerParams(
                dimension_semantics=("parallel",),
                vmem_limit_bytes=budget),
            cost_estimate=cost,
        )(x_p, w1_p, b1_p, w2_p, b2_p)
    else:
        out = pl.pallas_call(
            _encoder_streaming_kernel,
            out_shape=jax.ShapeDtypeStruct((Bpad, Lpad), out_dtype),
            grid_spec=pltpu.PrefetchScalarGridSpec(
                num_scalar_prefetch=0,
                grid=(nb, nk),
                in_specs=[
                    pl.BlockSpec((tb, Ipad), lambda i, k: (i, 0)),   # x tile
                    pl.BlockSpec((Ipad, tk), lambda i, k: (0, k)),   # W1 chunk
                    pl.BlockSpec((1, tk), lambda i, k: (0, k)),      # b1 chunk
                    pl.BlockSpec((tk, Lpad), lambda i, k: (k, 0)),   # W2 chunk
                    pl.BlockSpec((1, Lpad), lambda i, k: (0, 0)),    # b2
                ],
                out_specs=pl.BlockSpec((tb, Lpad), lambda i, k: (i, 0)),
                scratch_shapes=[pltpu.VMEM((tb, Lpad), jnp.float32)],
            ),
            compiler_params=pltpu.CompilerParams(
                dimension_semantics=("parallel", "arbitrary"),
                vmem_limit_bytes=budget),
            cost_estimate=cost,
        )(x_p, w1_p, b1_p, w2_p, b2_p)

    return out[:B, :latent_dim]


def init_params(key, input_dim, hidden_dim, latent_dim, dtype=jnp.float32):
    """PyTorch nn.Linear-style init (uniform +/- 1/sqrt(fan_in)); weights are
    stored transposed relative to PyTorch: (in_features, out_features)."""
    k1, k2, k3, k4 = jax.random.split(key, 4)
    bound1 = 1.0 / (input_dim ** 0.5)
    bound2 = 1.0 / (hidden_dim ** 0.5)
    w1 = jax.random.uniform(k1, (input_dim, hidden_dim), dtype, -bound1, bound1)
    b1 = jax.random.uniform(k2, (hidden_dim,), dtype, -bound1, bound1)
    w2 = jax.random.uniform(k3, (hidden_dim, latent_dim), dtype, -bound2, bound2)
    b2 = jax.random.uniform(k4, (latent_dim,), dtype, -bound2, bound2)
    return w1, b1, w2, b2


if __name__ == "__main__":
    # Small but non-trivial shapes: ragged batch (tests batch padding) and
    # non-128-multiple feature dims (tests lane padding).  Weights easily fit
    # VMEM here, so the resident single-axis plan is exercised.
    batch, input_dim, hidden_dim, latent_dim = 200, 100, 300, 40

    key = jax.random.PRNGKey(0)
    kx, kp = jax.random.split(key)
    x = jax.random.normal(kx, (batch, input_dim), jnp.float32)
    w1, b1, w2, b2 = init_params(kp, input_dim, hidden_dim, latent_dim)

    params, dims = prepare_params(w1, b1, w2, b2)
    out = encoder_forward(x, *params, dims=dims)
    out = jax.block_until_ready(out)

    # Pure-JAX f32 reference.  The kernel uses bf16 MXU operands with f32
    # accumulation, so the tolerance is bf16-limited (do not tighten).
    ref = jnp.maximum(x @ w1 + b1[None, :], 0.0) @ w2 + b2[None, :]
    assert out.shape == (batch, latent_dim)
    max_err = float(jnp.max(jnp.abs(out - ref)))
    assert jnp.allclose(out, ref, atol=5e-2, rtol=5e-2), max_err

    print("KERNEL_OK")
</pallas_src>

<mosaic_0001>
module attributes {stable_mosaic.version = 11 : i64} {
  func.func @_encoder_resident_kernel(%arg0: i32, %arg1: memref<208x128xbf16, #tpu.memory_space<vmem>>, %arg2: memref<128x384xbf16, #tpu.memory_space<vmem>>, %arg3: memref<1x384xf32, #tpu.memory_space<vmem>>, %arg4: memref<384x128xbf16, #tpu.memory_space<vmem>>, %arg5: memref<1x128xf32, #tpu.memory_space<vmem>>, %arg6: memref<208x128xf32, #tpu.memory_space<vmem>>) attributes {dimension_semantics = [#tpu.dimension_semantics<parallel>], iteration_bounds = array<i64: 1>, scalar_prefetch = 0 : i64, scratch_operands = 0 : i64, tpu.core_type = #tpu.core_type<tc>, window_params = [{transform_indices = @transform_0, window_bounds = array<i64: 208, 128>}, {pipeline_mode = #tpu.pipeline_mode<synchronous>, transform_indices = @transform_1, window_bounds = array<i64: 128, 384>}, {pipeline_mode = #tpu.pipeline_mode<synchronous>, transform_indices = @transform_2, window_bounds = array<i64: 1, 384>}, {pipeline_mode = #tpu.pipeline_mode<synchronous>, transform_indices = @transform_3, window_bounds = array<i64: 384, 128>}, {pipeline_mode = #tpu.pipeline_mode<synchronous>, transform_indices = @transform_4, window_bounds = array<i64: 1, 128>}, {transform_indices = @transform_5, window_bounds = array<i64: 208, 128>}]} {
    %c0 = arith.constant 0 : index
    %c0_0 = arith.constant 0 : index
    %0 = vector.load %arg1[%c0, %c0_0] : memref<208x128xbf16, #tpu.memory_space<vmem>>, vector<208x128xbf16>
    %c0_1 = arith.constant 0 : index
    %c0_2 = arith.constant 0 : index
    %1 = vector.load %arg2[%c0_1, %c0_2] : memref<128x384xbf16, #tpu.memory_space<vmem>>, vector<128x384xbf16>
    %cst = arith.constant dense<0.000000e+00> : vector<208x384xf32>
    %2 = tpu.matmul %0, %1, %cst {dimension_numbers = #tpu.dot_dimension_numbers<[1], [0], [0], [1], [0, 0, 1, 1], [], []>} : vector<208x128xbf16>, vector<128x384xbf16>, vector<208x384xf32> -> vector<208x384xf32>
    %c0_3 = arith.constant 0 : index
    %c0_4 = arith.constant 0 : index
    %3 = vector.load %arg3[%c0_3, %c0_4] : memref<1x384xf32, #tpu.memory_space<vmem>>, vector<1x384xf32>
    %4 = vector.broadcast %3 : vector<1x384xf32> to vector<208x384xf32>
    %5 = arith.addf %2, %4 : vector<208x384xf32>
    %cst_5 = arith.constant 0.000000e+00 : f32
    %6 = vector.broadcast %cst_5 : f32 to vector<208x384xf32>
    %7 = arith.maximumf %5, %6 : vector<208x384xf32>
    %8 = arith.truncf %7 : vector<208x384xf32> to vector<208x384xbf16>
    %c0_6 = arith.constant 0 : index
    %c0_7 = arith.constant 0 : index
    %9 = vector.load %arg4[%c0_6, %c0_7] : memref<384x128xbf16, #tpu.memory_space<vmem>>, vector<384x128xbf16>
    %cst_8 = arith.constant dense<0.000000e+00> : vector<208x128xf32>
    %10 = tpu.matmul %8, %9, %cst_8 {dimension_numbers = #tpu.dot_dimension_numbers<[1], [0], [0], [1], [0, 0, 1, 1], [], []>} : vector<208x384xbf16>, vector<384x128xbf16>, vector<208x128xf32> -> vector<208x128xf32>
    %c0_9 = arith.constant 0 : index
    %c0_10 = arith.constant 0 : index
    %11 = vector.load %arg5[%c0_9, %c0_10] : memref<1x128xf32, #tpu.memory_space<vmem>>, vector<1x128xf32>
    %12 = vector.broadcast %11 : vector<1x128xf32> to vector<208x128xf32>
    %13 = arith.addf %10, %12 : vector<208x128xf32>
    %c0_11 = arith.constant 0 : index
    %c0_12 = arith.constant 0 : index
    %14 = vector.load %arg6[%c0_11, %c0_12] : memref<208x128xf32, #tpu.memory_space<vmem>>, vector<208x128xf32>
    tpu.vector_store %arg6[%c0_11, %c0_12], %13 {strides = array<i32>} : memref<208x128xf32, #tpu.memory_space<vmem>>, vector<208x128xf32>,
    return
  }
  func.func @transform_0(%arg0: i32) -> (i32, i32) {
    %c0_i32 = arith.constant 0 : i32
    %c0_i32_0 = arith.constant 0 : i32
    return %arg0, %c0_i32 : i32, i32
  }
  func.func @transform_1(%arg0: i32) -> (i32, i32) {
    %c0_i32 = arith.constant 0 : i32
    %c0_i32_0 = arith.constant 0 : i32
    %c0_i32_1 = arith.constant 0 : i32
    return %c0_i32, %c0_i32_0 : i32, i32
  }
  func.func @transform_2(%arg0: i32) -> (i32, i32) {
    %c0_i32 = arith.constant 0 : i32
    %c0_i32_0 = arith.constant 0 : i32
    %c0_i32_1 = arith.constant 0 : i32
    return %c0_i32, %c0_i32_0 : i32, i32
  }
  func.func @transform_3(%arg0: i32) -> (i32, i32) {
    %c0_i32 = arith.constant 0 : i32
    %c0_i32_0 = arith.constant 0 : i32
    %c0_i32_1 = arith.constant 0 : i32
    return %c0_i32, %c0_i32_0 : i32, i32
  }
  func.func @transform_4(%arg0: i32) -> (i32, i32) {
    %c0_i32 = arith.constant 0 : i32
    %c0_i32_0 = arith.constant 0 : i32
    %c0_i32_1 = arith.constant 0 : i32
    return %c0_i32, %c0_i32_0 : i32, i32
  }
  func.func @transform_5(%arg0: i32) -> (i32, i32) {
    %c0_i32 = arith.constant 0 : i32
    %c0_i32_0 = arith.constant 0 : i32
    return %arg0, %c0_i32 : i32, i32
  }
}

</mosaic_0001>

<bundles_post_ra>
// kernel: encoder_forward.1
= control target key start
LH: loop header
LB: loop body
LE: loop exit
PB: predicated region body
PF: predicated region fallthrough
CT: control target
= control target key end

     0   :  { %v1628_v1 = vmov 0.0   ;;  %v1629_v2 = vmov 0   ;;  %vm1630_vm0 = vmmov 0   ;;  %v81_v63 = vlaneseq  ;;  %s2121_s1 = inlined_call_operand.vmem [shape: bf16[128,384], index: 1, kind: input, shape index: {}]   ;;  %s2122_s0 = inlined_call_operand.vmem [shape: bf16[208,128], index: 0, kind: input, shape index: {}]   ;;  %s2123_s3 = inlined_call_operand.vmem [shape: bf16[384,128], index: 3, kind: input, shape index: {}]   ;;  %s2124_s2 = inlined_call_operand.vmem [shape: f32[1,384], index: 2, kind: input, shape index: {}]   ;;  %s2125_s4 = inlined_call_operand.vmem [shape: f32[1,128], index: 4, kind: input, shape index: {}]   ;;  %s2126_s5 = inlined_call_operand.vmem [shape: f32[208,128], index: 5, kind: output, shape index: {}]  }
   0x1   :  { %v1559_v0 = vld [vmem:[%s2121_s1 + $0x4] ss:$12 sps:$4 sm:$0xff]   ;;  %1420 = vmatprep.subr.bf16.mxu1 %v1628_v1  ;;  %334 = vmatprep.mubr.bf16.mxu0 %v1629_v2  ;;  %v1561_v3 = vld [vmem:[%s2121_s1] ss:$12 sps:$4 sm:$0xff]   ;;  %v1562_v4 = vld [vmem:[%s2121_s1 + $0x8] ss:$12 sps:$4 sm:$0xff]  }
   0x2   :  { %1436 = vmatprep.mubr.msk.bf16.mxu1 %vm1630_vm0, %v1628_v1  ;;  %302 = vmatprep.subr.bf16.mxu0 %v1559_v0  ;;  %v1563_v5 = vld [vmem:[%s2121_s1 + $0x1c] ss:$12 sps:$4 sm:$0xff]   ;;  %v1565_v6 = vld [vmem:[%s2121_s1 + $0x18] ss:$12 sps:$4 sm:$0xff]   ;;  %v1566_v7 = vld [vmem:[%s2121_s1 + $0x20] ss:$12 sps:$4 sm:$0xff]  }
   0x3   :  { %303 = vmatpush1.bf16.msra.mxu0 %v1561_v3  ;;  %1421 = vmatpush3.bf16.msra.mxu1 %v1562_v4  ;;  %v1567_v8 = vld [vmem:[%s2121_s1 + $0x34] ss:$12 sps:$4 sm:$0xff]   ;;  %v1569_v9 = vld [vmem:[%s2121_s1 + $0x30] ss:$12 sps:$4 sm:$0xff]   ;;  %v1570_v10 = vld [vmem:[%s2121_s1 + $0x38] ss:$12 sps:$4 sm:$0xff]  }
   0x4   :  { %304 = vmatprep.subr.bf16.mxu0 %v1563_v5  ;;  %1422 = vmatprep.subr.bf16.mxu1 %v1628_v1  ;;  %v1571_v11 = vld [vmem:[%s2121_s1 + $0x4c] ss:$12 sps:$4 sm:$0xff]   ;;  %v1573_v12 = vld [vmem:[%s2121_s1 + $0x48] ss:$12 sps:$4 sm:$0xff]   ;;  %v1574_v13 = vld [vmem:[%s2121_s1 + $0x50] ss:$12 sps:$4 sm:$0xff]  }
   0x5   :  { %v1575_v14 = vld [vmem:[%s2121_s1 + $0x64] ss:$12 sps:$4 sm:$0xff]   ;;  %v1577_v15 = vld [vmem:[%s2121_s1 + $0x60] ss:$12 sps:$4 sm:$0xff]   ;;  %v1578_v16 = vld [vmem:[%s2121_s1 + $0x68] ss:$12 sps:$4 sm:$0xff]  }
   0x6   :  { %v1579_v17 = vld [vmem:[%s2121_s1 + $0x7c] ss:$12 sps:$4 sm:$0xff]   ;;  %v1581_v18 = vld [vmem:[%s2121_s1 + $0x78] ss:$12 sps:$4 sm:$0xff]   ;;  %v1582_v19 = vld [vmem:[%s2121_s1 + $0x80] ss:$12 sps:$4 sm:$0xff]  }
   0x7   :  { %305 = vmatpush1.bf16.msra.mxu0 %v1565_v6  ;;  %1423 = vmatpush3.bf16.msra.mxu1 %v1566_v7  ;;  %v1583_v20 = vld [vmem:[%s2121_s1 + $0x94] ss:$12 sps:$4 sm:$0xff]   ;;  %v1585_v21 = vld [vmem:[%s2121_s1 + $0x90] ss:$12 sps:$4 sm:$0xff]   ;;  %v1586_v22 = vld [vmem:[%s2121_s1 + $0x98] ss:$12 sps:$4 sm:$0xff]  }
   0x8   :  { %306 = vmatprep.subr.bf16.mxu0 %v1567_v8  ;;  %1424 = vmatprep.subr.bf16.mxu1 %v1628_v1  ;;  %v1587_v23 = vld [vmem:[%s2121_s1 + $0xac] ss:$12 sps:$4 sm:$0xff]   ;;  %v1589_v24 = vld [vmem:[%s2121_s1 + $0xa8] ss:$12 sps:$4 sm:$0xff]   ;;  %v1590_v25 = vld [vmem:[%s2121_s1 + $0xb0] ss:$12 sps:$4 sm:$0xff]  }
   0x9   :  { %v1591_v26 = vld [vmem:[%s2122_s0] sm:$0xff]   ;;  %v1607_v30 = vld [vmem:[%s2123_s3 + $0x48] sm:$0xff]   ;;  %v1610_v34 = vld [vmem:[%s2123_s3 + $0x50] sm:$0xff]   ;;  %v82_v0 = vshrl.u32 %v81_v63, 7 }
   0xa   :  { %v1604_v27 = vld [vmem:[%s2123_s3 + $0x40] sm:$0xff]   ;;  %v1592_v31 = vld [vmem:[%s2122_s0 + $0x8] sm:$0xff]   ;;  %v1611_v35 = vld [vmem:[%s2123_s3 + $0x10] sm:$0xff]  }
   0xb   :  { %307 = vmatpush1.bf16.msra.mxu0 %v1569_v9  ;;  %1425 = vmatpush3.bf16.msra.mxu1 %v1570_v10  ;;  %v1605_v28 = vld [vmem:[%s2123_s3] sm:$0xff]   ;;  %v1608_v32 = vld [vmem:[%s2123_s3 + $0x8] sm:$0xff]   ;;  %v1612_v36 = vld [vmem:[%s2123_s3 + $0x90] sm:$0xff]   ;;  %v87_v4 = vsub.s32 1, %v82_v0  ;;  %v91_v5 = vsub.s32 2, %v82_v0 }
   0xc   :  { %308 = vmatprep.subr.bf16.mxu0 %v1571_v11  ;;  %1426 = vmatprep.subr.bf16.mxu1 %v1628_v1  ;;  %v1606_v29 = vld [vmem:[%s2123_s3 + $0x80] sm:$0xff]   ;;  %v1609_v33 = vld [vmem:[%s2123_s3 + $0x88] sm:$0xff]   ;;  %v1613_v37 = vld [vmem:[%s2123_s3 + $0x58] sm:$0xff]  }
   0xd   :  { %v1614_v38 = vld [vmem:[%s2123_s3 + $0x18] sm:$0xff]   ;;  %v1616_v40 = vld [vmem:[%s2123_s3 + $0x60] sm:$0xff]   ;;  %v1593_v41 = vld [vmem:[%s2122_s0 + $0x10] sm:$0xff]  }
   0xe   :  { %v1615_v39 = vld [vmem:[%s2123_s3 + $0x98] sm:$0xff]   ;;  %v1617_v42 = vld [vmem:[%s2123_s3 + $0x20] sm:$0xff]   ;;  %v1619_v44 = vld [vmem:[%s2123_s3 + $0x68] sm:$0xff]  }
   0xf   :  { %309 = vmatpush1.bf16.msra.mxu0 %v1573_v12  ;;  %1427 = vmatpush3.bf16.msra.mxu1 %v1574_v13  ;;  %v1618_v43 = vld [vmem:[%s2123_s3 + $0xa0] sm:$0xff]   ;;  %v1620_v45 = vld [vmem:[%s2123_s3 + $0x28] sm:$0xff]   ;;  %v1622_v47 = vld [vmem:[%s2123_s3 + $0x70] sm:$0xff]  }
  0x10   :  { %310 = vmatprep.subr.bf16.mxu0 %v1575_v14  ;;  %1428 = vmatprep.subr.bf16.mxu1 %v1628_v1  ;;  %v1621_v46 = vld [vmem:[%s2123_s3 + $0xa8] sm:$0xff]   ;;  %v1594_v48 = vld [vmem:[%s2122_s0 + $0x18] sm:$0xff]   ;;  %v1623_v49 = vld [vmem:[%s2123_s3 + $0x30] sm:$0xff]  }
  0x11   :  { %v1624_v50 = vld [vmem:[%s2123_s3 + $0xb0] sm:$0xff]   ;;  %v1625_v51 = vld [vmem:[%s2123_s3 + $0x78] sm:$0xff]   ;;  %v1595_v53 = vld [vmem:[%s2122_s0 + $0x20] sm:$0xff]  }
  0x12   :  { %v1626_v52 = vld [vmem:[%s2123_s3 + $0x38] sm:$0xff]   ;;  %v1596_v54 = vld [vmem:[%s2122_s0 + $0x28] sm:$0xff]   ;;  %v1597_v55 = vld [vmem:[%s2122_s0 + $0x30] sm:$0xff]  }
  0x13   :  { %311 = vmatpush1.bf16.msra.mxu0 %v1577_v15  ;;  %1429 = vmatpush3.bf16.msra.mxu1 %v1578_v16  ;;  %v1598_v56 = vld [vmem:[%s2122_s0 + $0x38] sm:$0xff]   ;;  %v1599_v57 = vld [vmem:[%s2122_s0 + $0x40] sm:$0xff]   ;;  %v1600_v58 = vld [vmem:[%s2122_s0 + $0x48] sm:$0xff]  }
  0x14   :  { %312 = vmatprep.subr.bf16.mxu0 %v1579_v17  ;;  %1430 = vmatprep.subr.bf16.mxu1 %v1628_v1  ;;  %v1601_v59 = vld [vmem:[%s2122_s0 + $0x50] sm:$0xff]   ;;  %v1602_v60 = vld [vmem:[%s2122_s0 + $0x58] sm:$0xff]   ;;  %v1603_v62 = vld [vmem:[%s2122_s0 + $0x60] sm:$0xff]  }
  0x15   :  { %v1627_v61 = vld [vmem:[%s2123_s3 + $0xb8] sm:$0xff]   ;;  %v79_v3 = vld [vmem:[%s2124_s2] sm:$0x7] }
  0x16   :  { %v1906_v7 = vrot.slane %v79_v3, %v87_v4  ;;  %v1908_v8 = vrot.slane %v79_v3, %v91_v5 }
  0x17   :  { %313 = vmatpush1.bf16.msra.mxu0 %v1581_v18  ;;  %1431 = vmatpush3.bf16.msra.mxu1 %v1582_v19 }
  0x18   :  { %314 = vmatprep.subr.bf16.mxu0 %v1583_v20  ;;  %1432 = vmatprep.subr.bf16.mxu1 %v1628_v1 }
  0x1b   :  { %315 = vmatpush1.bf16.msra.mxu0 %v1585_v21  ;;  %1433 = vmatpush3.bf16.msra.mxu1 %v1586_v22 }
  0x1c   :  { %316 = vmatprep.subr.bf16.mxu0 %v1587_v23  ;;  %1434 = vmatprep.subr.bf16.mxu1 %v1628_v1 }
  0x1f   :  { %317 = vmatpush1.bf16.msra.mxu0 %v1589_v24  ;;  %1435 = vmatpush3.bf16.msra.mxu1 %v1590_v25 }
  0x20   :  { %1488 = vmatprep.subr.bf16.mxu1 %v1628_v1  ;;  %1305 = vmatprep.subr.bf16.mxu0 %v1604_v27 }
  0x22   :  { %335 = vmatmul.mubr.bf16.vlgmr.msra.gmra.mrb[0].mxu0 %v1591_v26  ;;  %1437 = vmatmul.mubr.bf16.vlgmr.msra.gmra.mrb[0].mxu1 %v1591_v26 }
  0x23   :  { %344 = vmatprep.mubr.bf16.mxu0 %v1629_v2  ;;  %1440 = vmatprep.mubr.msk.bf16.mxu1 %vm1630_vm0, %v1628_v1 }
  0x24   :  { %1306 = vmatpush3.bf16.msra.mxu0 %v1605_v28  ;;  %1489 = vmatpush3.bf16.msra.mxu1 %v1606_v29 }
  0x25   :  { %1307 = vmatprep.subr.bf16.mxu0 %v1607_v30  ;;  %1490 = vmatprep.subr.bf16.mxu1 %v1628_v1 }
  0x28   :  { %1308 = vmatpush3.bf16.msra.mxu0 %v1608_v32  ;;  %1491 = vmatpush3.bf16.msra.mxu1 %v1609_v33 }
  0x29   :  { %1309 = vmatprep.subr.bf16.mxu0 %v1610_v34  ;;  %1492 = vmatprep.subr.bf16.mxu1 %v1628_v1 }
  0x2a   :  { %345 = vmatmul.mubr.bf16.gmra.mrb[4].mxu0 %v1592_v31  ;;  %1441 = vmatmul.mubr.bf16.gmra.mrb[4].mxu1 %v1592_v31 }
  0x2b   :  { %354 = vmatprep.mubr.bf16.mxu0 %v1629_v2  ;;  %1444 = vmatprep.mubr.msk.bf16.mxu1 %vm1630_vm0, %v1628_v1 }
  0x2c   :  { %1310 = vmatpush3.bf16.msra.mxu0 %v1611_v35  ;;  %1493 = vmatpush3.bf16.msra.mxu1 %v1612_v36 }
  0x2d   :  { %1311 = vmatprep.subr.bf16.mxu0 %v1613_v37  ;;  %1494 = vmatprep.subr.bf16.mxu1 %v1628_v1 }
  0x30   :  { %1312 = vmatpush3.bf16.msra.mxu0 %v1614_v38  ;;  %1495 = vmatpush3.bf16.msra.mxu1 %v1615_v39 }
  0x31   :  { %1313 = vmatprep.subr.bf16.mxu0 %v1616_v40  ;;  %1496 = vmatprep.subr.bf16.mxu1 %v1628_v1 }
  0x32   :  { %355 = vmatmul.mubr.bf16.gmra.mrb[8].mxu0 %v1593_v41  ;;  %1445 = vmatmul.mubr.bf16.gmra.mrb[8].mxu1 %v1593_v41 }
  0x33   :  { %364 = vmatprep.mubr.bf16.mxu0 %v1629_v2  ;;  %1448 = vmatprep.mubr.msk.bf16.mxu1 %vm1630_vm0, %v1628_v1 }
  0x34   :  { %1314 = vmatpush3.bf16.msra.mxu0 %v1617_v42  ;;  %1497 = vmatpush3.bf16.msra.mxu1 %v1618_v43 }
  0x35   :  { %1315 = vmatprep.subr.bf16.mxu0 %v1619_v44  ;;  %1498 = vmatprep.subr.bf16.mxu1 %v1628_v1 }
  0x38   :  { %1316 = vmatpush3.bf16.msra.mxu0 %v1620_v45  ;;  %1499 = vmatpush3.bf16.msra.mxu1 %v1621_v46 }
  0x39   :  { %1317 = vmatprep.subr.bf16.mxu0 %v1622_v47  ;;  %1500 = vmatprep.subr.bf16.mxu1 %v1628_v1 }
  0x3a   :  { %365 = vmatmul.mubr.bf16.gmra.mrb[12].mxu0 %v1594_v48  ;;  %1449 = vmatmul.mubr.bf16.gmra.mrb[12].mxu1 %v1594_v48 }
  0x3b   :  { %374 = vmatprep.mubr.bf16.mxu0 %v1629_v2  ;;  %1452 = vmatprep.mubr.msk.bf16.mxu1 %vm1630_vm0, %v1628_v1 }
  0x3c   :  { %1318 = vmatpush3.bf16.msra.mxu0 %v1623_v49  ;;  %1501 = vmatpush3.bf16.msra.mxu1 %v1624_v50 }
  0x3d   :  { %1319 = vmatprep.subr.bf16.mxu0 %v1625_v51  ;;  %1502 = vmatprep.subr.bf16.mxu1 %v1628_v1 }
  0x40   :  { %1320 = vmatpush3.bf16.msra.mxu0 %v1626_v52  ;;  %1503 = vmatpush3.bf16.msra.mxu1 %v1627_v61 }
  0x42   :  { %375 = vmatmul.mubr.bf16.gmra.mrb[16].mxu0 %v1595_v53  ;;  %1453 = vmatmul.mubr.bf16.gmra.mrb[16].mxu1 %v1595_v53 }
  0x43   :  { %384 = vmatprep.mubr.bf16.mxu0 %v1629_v2  ;;  %1456 = vmatprep.mubr.msk.bf16.mxu1 %vm1630_vm0, %v1628_v1 }
  0x4a   :  { %385 = vmatmul.mubr.bf16.gmra.mrb[20].mxu0 %v1596_v54  ;;  %1457 = vmatmul.mubr.bf16.gmra.mrb[20].mxu1 %v1596_v54 }
  0x4b   :  { %394 = vmatprep.mubr.bf16.mxu0 %v1629_v2  ;;  %1460 = vmatprep.mubr.msk.bf16.mxu1 %vm1630_vm0, %v1628_v1 }
  0x52   :  { %395 = vmatmul.mubr.bf16.gmra.mrb[24].mxu0 %v1597_v55  ;;  %1461 = vmatmul.mubr.bf16.gmra.mrb[24].mxu1 %v1597_v55 }
  0x53   :  { %404 = vmatprep.mubr.bf16.mxu0 %v1629_v2  ;;  %1464 = vmatprep.mubr.msk.bf16.mxu1 %vm1630_vm0, %v1628_v1 }
  0x5a   :  { %405 = vmatmul.mubr.bf16.gmra.mrb[28].mxu0 %v1598_v56  ;;  %1465 = vmatmul.mubr.bf16.gmra.mrb[28].mxu1 %v1598_v56 }
  0x5b   :  { %414 = vmatprep.mubr.bf16.mxu0 %v1629_v2  ;;  %1468 = vmatprep.mubr.msk.bf16.mxu1 %vm1630_vm0, %v1628_v1 }
  0x62   :  { %415 = vmatmul.mubr.bf16.gmra.mrb[32].mxu0 %v1599_v57  ;;  %1469 = vmatmul.mubr.bf16.gmra.mrb[32].mxu1 %v1599_v57 }
  0x63   :  { %424 = vmatprep.mubr.bf16.mxu0 %v1629_v2  ;;  %1472 = vmatprep.mubr.msk.bf16.mxu1 %vm1630_vm0, %v1628_v1 }
  0x6a   :  { %425 = vmatmul.mubr.bf16.gmra.mrb[36].mxu0 %v1600_v58  ;;  %1473 = vmatmul.mubr.bf16.gmra.mrb[36].mxu1 %v1600_v58 }
  0x6b   :  { %434 = vmatprep.mubr.bf16.mxu0 %v1629_v2  ;;  %1476 = vmatprep.mubr.msk.bf16.mxu1 %vm1630_vm0, %v1628_v1 }
  0x72   :  { %435 = vmatmul.mubr.bf16.gmra.mrb[40].mxu0 %v1601_v59  ;;  %1477 = vmatmul.mubr.bf16.gmra.mrb[40].mxu1 %v1601_v59 }
  0x73   :  { %444 = vmatprep.mubr.bf16.mxu0 %v1629_v2  ;;  %1480 = vmatprep.mubr.msk.bf16.mxu1 %vm1630_vm0, %v1628_v1 }
  0x7a   :  { %445 = vmatmul.mubr.bf16.gmra.mrb[44].mxu0 %v1602_v60  ;;  %1481 = vmatmul.mubr.bf16.gmra.mrb[44].mxu1 %v1602_v60 }
  0x7b   :  { %454 = vmatprep.mubr.bf16.mxu0 %v1629_v2  ;;  %1484 = vmatprep.mubr.msk.bf16.mxu1 %vm1630_vm0, %v1628_v1  ;;  %v83_v2 = vsub.s32 0, %v82_v0 }
  0x7d   :  { %v1904_v6 = vrot.slane %v79_v3, %v83_v2 }
  0x82   :  { %455 = vmatmul.mubr.bf16.gmra.mrb[48].mxu0 %v1603_v62  ;;  %1485 = vmatmul.mubr.bf16.gmra.mrb[48].mxu1 %v1603_v62 }
  0x83   :  { %1504 = vmatprep.mubr.msk.bf16.mxu1 %vm1630_vm0, %v1628_v1 }
  0xf5   :  { %v336_v9 = vpop.f32.mrb[0].mxu0  ;;  %v499_v12 = vpop.f32.mrb[0].mxu1 }
  0xf6   :  { %v337_v10 = vadd.f32 %v336_v9, %v1904_v6  ;;  %v338_v11 = vpop.f32.mrb[1].mxu0  ;;  %v500_v15 = vadd.f32 %v499_v12, %v1908_v8  ;;  %v1438_v16 = vpop.f32.mrb[1].mxu1 }
  0xf7   :  { %v339_v13 = vadd.f32 %v338_v11, %v1906_v7  ;;  %v340_v14 = vpop.f32.mrb[2].mxu0  ;;  %v502_v19 = vpop.f32.mrb[2].mxu1 }
  0xf8   :  { %v341_v17 = vadd.f32 %v340_v14, %v1904_v6  ;;  %v342_v18 = vpop.f32.mrb[3].mxu0  ;;  %v604_v20 = vmax.f32 %v500_v15, 0.0  ;;  %v503_v22 = vadd.f32 %v502_v19, %v1908_v8  ;;  %v1439_v23 = vpop.f32.mrb[3].mxu1  ;;  %v602_v24 = vmax.f32 %v337_v10, 0.0 }
  0xf9   :  { %v343_v21 = vadd.f32 %v342_v18, %v1906_v7  ;;  %v603_v26 = vmax.f32 %v339_v13, 0.0 }
  0xfa   :  { %v605_v25 = vmax.f32 %v341_v17, 0.0  ;;  %v607_v28 = vmax.f32 %v503_v22, 0.0 }
  0xfb   :  { %v606_v27 = vmax.f32 %v343_v21, 0.0 }
  0xfc   :  { %v680_v29 = vpack.c.bf16 %v605_v25, %v602_v24  ;;  %v682_v31 = vpack.c.bf16 %v607_v28, %v604_v20 }
  0xfd   :  { %v681_v30 = vpack.c.bf16 %v606_v27, %v603_v26  ;;  %v346_v32 = vpop.f32.mrb[4].mxu0  ;;  %v507_v35 = vpop.f32.mrb[4].mxu1 }
  0xfe   :  { %v347_v33 = vadd.f32 %v346_v32, %v1904_v6  ;;  %v348_v34 = vpop.f32.mrb[5].mxu0  ;;  %v508_v38 = vadd.f32 %v507_v35, %v1908_v8  ;;  %v1442_v39 = vpop.f32.mrb[5].mxu1  ;;  %1505 = vmatmul.mubr.bf16.vlgmr.msra.gmra.mrb[52].mxu1 %v682_v31 }
  0xff   :  { %v349_v36 = vadd.f32 %v348_v34, %v1906_v7  ;;  %v350_v37 = vpop.f32.mrb[6].mxu0  ;;  %950 = vmatprep.mubr.bf16.mxu0 %v681_v30  ;;  %v510_v42 = vpop.f32.mrb[6].mxu1  ;;  %1508 = vmatprep.mubr.msk.bf16.mxu1 %vm1630_vm0, %v1628_v1 }
 0x100   :  { %v351_v40 = vadd.f32 %v350_v37, %v1904_v6  ;;  %v352_v41 = vpop.f32.mrb[7].mxu0  ;;  %951 = vmatmul.mubr.bf16.vlgmr.msra.gmra.mrb[52].mxu0 %v680_v29  ;;  %v610_v43 = vmax.f32 %v508_v38, 0.0  ;;  %v511_v45 = vadd.f32 %v510_v42, %v1908_v8  ;;  %v1443_v46 = vpop.f32.mrb[7].mxu1  ;;  %v608_v47 = vmax.f32 %v347_v33, 0.0 }
 0x101   :  { %v353_v44 = vadd.f32 %v352_v41, %v1906_v7  ;;  %v609_v49 = vmax.f32 %v349_v36, 0.0 }
 0x102   :  { %v611_v48 = vmax.f32 %v351_v40, 0.0  ;;  %v613_v51 = vmax.f32 %v511_v45, 0.0 }
 0x103   :  { %v612_v50 = vmax.f32 %v353_v44, 0.0 }
 0x104   :  { %v683_v52 = vpack.c.bf16 %v611_v48, %v608_v47  ;;  %v685_v54 = vpack.c.bf16 %v613_v51, %v610_v43 }
 0x105   :  { %v684_v53 = vpack.c.bf16 %v612_v50, %v609_v49  ;;  %v356_v55 = vpop.f32.mrb[8].mxu0  ;;  %v515_v58 = vpop.f32.mrb[8].mxu1 }
 0x106   :  { %v357_v56 = vadd.f32 %v356_v55, %v1904_v6  ;;  %v358_v57 = vpop.f32.mrb[9].mxu0  ;;  %v516_v61 = vadd.f32 %v515_v58, %v1908_v8  ;;  %v1446_v62 = vpop.f32.mrb[9].mxu1  ;;  %1509 = vmatmul.mubr.bf16.gmra.mrb[56].mxu1 %v685_v54 }
 0x107   :  { %v359_v59 = vadd.f32 %v358_v57, %v1906_v7  ;;  %v360_v60 = vpop.f32.mrb[10].mxu0  ;;  %958 = vmatprep.mubr.bf16.mxu0 %v684_v53  ;;  %v518_v2 = vpop.f32.mrb[10].mxu1  ;;  %1512 = vmatprep.mubr.msk.bf16.mxu1 %vm1630_vm0, %v1628_v1 }
 0x108   :  { %v361_v63 = vadd.f32 %v360_v60, %v1904_v6  ;;  %v362_v0 = vpop.f32.mrb[11].mxu0  ;;  %959 = vmatmul.mubr.bf16.gmra.mrb[56].mxu0 %v683_v52  ;;  %v616_v3 = vmax.f32 %v516_v61, 0.0  ;;  %v519_v5 = vadd.f32 %v518_v2, %v1908_v8  ;;  %v1447_v9 = vpop.f32.mrb[11].mxu1  ;;  %v614_v10 = vmax.f32 %v357_v56, 0.0 }
 0x109   :  { %v363_v4 = vadd.f32 %v362_v0, %v1906_v7  ;;  %v615_v12 = vmax.f32 %v359_v59, 0.0 }
 0x10a   :  { %v617_v11 = vmax.f32 %v361_v63, 0.0  ;;  %v619_v14 = vmax.f32 %v519_v5, 0.0 }
 0x10b   :  { %v618_v13 = vmax.f32 %v363_v4, 0.0 }
 0x10c   :  { %v686_v15 = vpack.c.bf16 %v617_v11, %v614_v10  ;;  %v688_v17 = vpack.c.bf16 %v619_v14, %v616_v3 }
 0x10d   :  { %v687_v16 = vpack.c.bf16 %v618_v13, %v615_v12  ;;  %v366_v18 = vpop.f32.mrb[12].mxu0  ;;  %v523_v21 = vpop.f32.mrb[12].mxu1 }
 0x10e   :  { %v367_v19 = vadd.f32 %v366_v18, %v1904_v6  ;;  %v368_v20 = vpop.f32.mrb[13].mxu0  ;;  %v524_v24 = vadd.f32 %v523_v21, %v1908_v8  ;;  %v1450_v25 = vpop.f32.mrb[13].mxu1  ;;  %1513 = vmatmul.mubr.bf16.gmra.mrb[60].mxu1 %v688_v17 }
 0x10f   :  { %v369_v22 = vadd.f32 %v368_v20, %v1906_v7  ;;  %v370_v23 = vpop.f32.mrb[14].mxu0  ;;  %966 = vmatprep.mubr.bf16.mxu0 %v687_v16  ;;  %v526_v28 = vpop.f32.mrb[14].mxu1  ;;  %1516 = vmatprep.mubr.msk.bf16.mxu1 %vm1630_vm0, %v1628_v1 }
 0x110   :  { %v371_v26 = vadd.f32 %v370_v23, %v1904_v6  ;;  %v372_v27 = vpop.f32.mrb[15].mxu0  ;;  %967 = vmatmul.mubr.bf16.gmra.mrb[60].mxu0 %v686_v15  ;;  %v622_v29 = vmax.f32 %v524_v24, 0.0  ;;  %v527_v31 = vadd.f32 %v526_v28, %v1908_v8  ;;  %v1451_v32 = vpop.f32.mrb[15].mxu1  ;;  %v620_v33 = vmax.f32 %v367_v19, 0.0 }
 0x111   :  { %v373_v30 = vadd.f32 %v372_v27, %v1906_v7  ;;  %v621_v35 = vmax.f32 %v369_v22, 0.0 }
 0x112   :  { %v623_v34 = vmax.f32 %v371_v26, 0.0  ;;  %v625_v37 = vmax.f32 %v527_v31, 0.0 }
 0x113   :  { %v624_v36 = vmax.f32 %v373_v30, 0.0 }
 0x114   :  { %v689_v38 = vpack.c.bf16 %v623_v34, %v620_v33  ;;  %v691_v40 = vpack.c.bf16 %v625_v37, %v622_v29 }
 0x115   :  { %v690_v39 = vpack.c.bf16 %v624_v36, %v621_v35  ;;  %v376_v41 = vpop.f32.mrb[16].mxu0  ;;  %v531_v44 = vpop.f32.mrb[16].mxu1 }
 0x116   :  { %v377_v42 = vadd.f32 %v376_v41, %v1904_v6  ;;  %v378_v43 = vpop.f32.mrb[17].mxu0  ;;  %v532_v47 = vadd.f32 %v531_v44, %v1908_v8  ;;  %v1454_v48 = vpop.f32.mrb[17].mxu1  ;;  %1517 = vmatmul.mubr.bf16.gmra.mrb[64].mxu1 %v691_v40 }
 0x117   :  { %v379_v45 = vadd.f32 %v378_v43, %v1906_v7  ;;  %v380_v46 = vpop.f32.mrb[18].mxu0  ;;  %974 = vmatprep.mubr.bf16.mxu0 %v690_v39  ;;  %v534_v51 = vpop.f32.mrb[18].mxu1  ;;  %1520 = vmatprep.mubr.msk.bf16.mxu1 %vm1630_vm0, %v1628_v1 }
 0x118   :  { %v381_v49 = vadd.f32 %v380_v46, %v1904_v6  ;;  %v382_v50 = vpop.f32.mrb[19].mxu0  ;;  %975 = vmatmul.mubr.bf16.gmra.mrb[64].mxu0 %v689_v38  ;;  %v628_v52 = vmax.f32 %v532_v47, 0.0  ;;  %v535_v54 = vadd.f32 %v534_v51, %v1908_v8  ;;  %v1455_v55 = vpop.f32.mrb[19].mxu1  ;;  %v626_v56 = vmax.f32 %v377_v42, 0.0 }
 0x119   :  { %v383_v53 = vadd.f32 %v382_v50, %v1906_v7  ;;  %v627_v58 = vmax.f32 %v379_v45, 0.0 }
 0x11a   :  { %v629_v57 = vmax.f32 %v381_v49, 0.0  ;;  %v631_v60 = vmax.f32 %v535_v54, 0.0 }
 0x11b   :  { %v630_v59 = vmax.f32 %v383_v53, 0.0 }
 0x11c   :  { %v692_v61 = vpack.c.bf16 %v629_v57, %v626_v56  ;;  %v694_v63 = vpack.c.bf16 %v631_v60, %v628_v52 }
 0x11d   :  { %v693_v62 = vpack.c.bf16 %v630_v59, %v627_v58  ;;  %v386_v0 = vpop.f32.mrb[20].mxu0  ;;  %v539_v4 = vpop.f32.mrb[20].mxu1 }
 0x11e   :  { %v387_v2 = vadd.f32 %v386_v0, %v1904_v6  ;;  %v388_v3 = vpop.f32.mrb[21].mxu0  ;;  %v540_v10 = vadd.f32 %v539_v4, %v1908_v8  ;;  %v1458_v11 = vpop.f32.mrb[21].mxu1  ;;  %1521 = vmatmul.mubr.bf16.gmra.mrb[68].mxu1 %v694_v63 }
 0x11f   :  { %v389_v5 = vadd.f32 %v388_v3, %v1906_v7  ;;  %v390_v9 = vpop.f32.mrb[22].mxu0  ;;  %982 = vmatprep.mubr.bf16.mxu0 %v693_v62  ;;  %v542_v14 = vpop.f32.mrb[22].mxu1  ;;  %1524 = vmatprep.mubr.msk.bf16.mxu1 %vm1630_vm0, %v1628_v1 }
 0x120   :  { %v391_v12 = vadd.f32 %v390_v9, %v1904_v6  ;;  %v392_v13 = vpop.f32.mrb[23].mxu0  ;;  %983 = vmatmul.mubr.bf16.gmra.mrb[68].mxu0 %v692_v61  ;;  %v634_v15 = vmax.f32 %v540_v10, 0.0  ;;  %v543_v17 = vadd.f32 %v542_v14, %v1908_v8  ;;  %v1459_v18 = vpop.f32.mrb[23].mxu1  ;;  %v632_v19 = vmax.f32 %v387_v2, 0.0 }
 0x121   :  { %v393_v16 = vadd.f32 %v392_v13, %v1906_v7  ;;  %v633_v21 = vmax.f32 %v389_v5, 0.0 }
 0x122   :  { %v635_v20 = vmax.f32 %v391_v12, 0.0  ;;  %v637_v23 = vmax.f32 %v543_v17, 0.0 }
 0x123   :  { %v636_v22 = vmax.f32 %v393_v16, 0.0 }
 0x124   :  { %v695_v24 = vpack.c.bf16 %v635_v20, %v632_v19  ;;  %v697_v26 = vpack.c.bf16 %v637_v23, %v634_v15 }
 0x125   :  { %v696_v25 = vpack.c.bf16 %v636_v22, %v633_v21  ;;  %v396_v27 = vpop.f32.mrb[24].mxu0  ;;  %v547_v30 = vpop.f32.mrb[24].mxu1 }
 0x126   :  { %v397_v28 = vadd.f32 %v396_v27, %v1904_v6  ;;  %v398_v29 = vpop.f32.mrb[25].mxu0  ;;  %v548_v33 = vadd.f32 %v547_v30, %v1908_v8  ;;  %v1462_v34 = vpop.f32.mrb[25].mxu1  ;;  %1525 = vmatmul.mubr.bf16.gmra.mrb[72].mxu1 %v697_v26 }
 0x127   :  { %v399_v31 = vadd.f32 %v398_v29, %v1906_v7  ;;  %v400_v32 = vpop.f32.mrb[26].mxu0  ;;  %990 = vmatprep.mubr.bf16.mxu0 %v696_v25  ;;  %v550_v37 = vpop.f32.mrb[26].mxu1  ;;  %1528 = vmatprep.mubr.msk.bf16.mxu1 %vm1630_vm0, %v1628_v1 }
 0x128   :  { %v401_v35 = vadd.f32 %v400_v32, %v1904_v6  ;;  %v402_v36 = vpop.f32.mrb[27].mxu0  ;;  %991 = vmatmul.mubr.bf16.gmra.mrb[72].mxu0 %v695_v24  ;;  %v640_v38 = vmax.f32 %v548_v33, 0.0  ;;  %v551_v40 = vadd.f32 %v550_v37, %v1908_v8  ;;  %v1463_v41 = vpop.f32.mrb[27].mxu1  ;;  %v638_v42 = vmax.f32 %v397_v28, 0.0 }
 0x129   :  { %v403_v39 = vadd.f32 %v402_v36, %v1906_v7  ;;  %v639_v44 = vmax.f32 %v399_v31, 0.0 }
 0x12a   :  { %v641_v43 = vmax.f32 %v401_v35, 0.0  ;;  %v643_v46 = vmax.f32 %v551_v40, 0.0 }
 0x12b   :  { %v642_v45 = vmax.f32 %v403_v39, 0.0 }
 0x12c   :  { %v698_v47 = vpack.c.bf16 %v641_v43, %v638_v42  ;;  %v700_v49 = vpack.c.bf16 %v643_v46, %v640_v38 }
 0x12d   :  { %v699_v48 = vpack.c.bf16 %v642_v45, %v639_v44  ;;  %v406_v50 = vpop.f32.mrb[28].mxu0  ;;  %v555_v53 = vpop.f32.mrb[28].mxu1 }
 0x12e   :  { %v407_v51 = vadd.f32 %v406_v50, %v1904_v6  ;;  %v408_v52 = vpop.f32.mrb[29].mxu0  ;;  %v556_v56 = vadd.f32 %v555_v53, %v1908_v8  ;;  %v1466_v57 = vpop.f32.mrb[29].mxu1  ;;  %1529 = vmatmul.mubr.bf16.gmra.mrb[76].mxu1 %v700_v49 }
 0x12f   :  { %v409_v54 = vadd.f32 %v408_v52, %v1906_v7  ;;  %v410_v55 = vpop.f32.mrb[30].mxu0  ;;  %998 = vmatprep.mubr.bf16.mxu0 %v699_v48  ;;  %v558_v60 = vpop.f32.mrb[30].mxu1  ;;  %1532 = vmatprep.mubr.msk.bf16.mxu1 %vm1630_vm0, %v1628_v1 }
 0x130   :  { %v411_v58 = vadd.f32 %v410_v55, %v1904_v6  ;;  %v412_v59 = vpop.f32.mrb[31].mxu0  ;;  %999 = vmatmul.mubr.bf16.gmra.mrb[76].mxu0 %v698_v47  ;;  %v646_v61 = vmax.f32 %v556_v56, 0.0  ;;  %v559_v63 = vadd.f32 %v558_v60, %v1908_v8  ;;  %v1467_v0 = vpop.f32.mrb[31].mxu1  ;;  %v644_v2 = vmax.f32 %v407_v51, 0.0 }
 0x131   :  { %v413_v62 = vadd.f32 %v412_v59, %v1906_v7  ;;  %v645_v4 = vmax.f32 %v409_v54, 0.0 }
 0x132   :  { %v647_v3 = vmax.f32 %v411_v58, 0.0  ;;  %v649_v9 = vmax.f32 %v559_v63, 0.0 }
 0x133   :  { %v648_v5 = vmax.f32 %v413_v62, 0.0 }
 0x134   :  { %v701_v10 = vpack.c.bf16 %v647_v3, %v644_v2  ;;  %v703_v12 = vpack.c.bf16 %v649_v9, %v646_v61 }
 0x135   :  { %v702_v11 = vpack.c.bf16 %v648_v5, %v645_v4  ;;  %v416_v13 = vpop.f32.mrb[32].mxu0  ;;  %v563_v16 = vpop.f32.mrb[32].mxu1 }
 0x136   :  { %v417_v14 = vadd.f32 %v416_v13, %v1904_v6  ;;  %v418_v15 = vpop.f32.mrb[33].mxu0  ;;  %v564_v19 = vadd.f32 %v563_v16, %v1908_v8  ;;  %v1470_v20 = vpop.f32.mrb[33].mxu1  ;;  %1533 = vmatmul.mubr.bf16.gmra.mrb[80].mxu1 %v703_v12 }
 0x137   :  { %v419_v17 = vadd.f32 %v418_v15, %v1906_v7  ;;  %v420_v18 = vpop.f32.mrb[34].mxu0  ;;  %1006 = vmatprep.mubr.bf16.mxu0 %v702_v11  ;;  %v566_v23 = vpop.f32.mrb[34].mxu1  ;;  %1536 = vmatprep.mubr.msk.bf16.mxu1 %vm1630_vm0, %v1628_v1 }
 0x138   :  { %v421_v21 = vadd.f32 %v420_v18, %v1904_v6  ;;  %v422_v22 = vpop.f32.mrb[35].mxu0  ;;  %1007 = vmatmul.mubr.bf16.gmra.mrb[80].mxu0 %v701_v10  ;;  %v652_v24 = vmax.f32 %v564_v19, 0.0  ;;  %v567_v26 = vadd.f32 %v566_v23, %v1908_v8  ;;  %v1471_v27 = vpop.f32.mrb[35].mxu1  ;;  %v650_v28 = vmax.f32 %v417_v14, 0.0 }
 0x139   :  { %v423_v25 = vadd.f32 %v422_v22, %v1906_v7  ;;  %v651_v30 = vmax.f32 %v419_v17, 0.0 }
 0x13a   :  { %v653_v29 = vmax.f32 %v421_v21, 0.0  ;;  %v655_v32 = vmax.f32 %v567_v26, 0.0 }
 0x13b   :  { %v654_v31 = vmax.f32 %v423_v25, 0.0 }
 0x13c   :  { %v704_v33 = vpack.c.bf16 %v653_v29, %v650_v28  ;;  %v706_v35 = vpack.c.bf16 %v655_v32, %v652_v24 }
 0x13d   :  { %v705_v34 = vpack.c.bf16 %v654_v31, %v651_v30  ;;  %v426_v36 = vpop.f32.mrb[36].mxu0  ;;  %v571_v39 = vpop.f32.mrb[36].mxu1 }
 0x13e   :  { %v427_v37 = vadd.f32 %v426_v36, %v1904_v6  ;;  %v428_v38 = vpop.f32.mrb[37].mxu0  ;;  %v572_v42 = vadd.f32 %v571_v39, %v1908_v8  ;;  %v1474_v43 = vpop.f32.mrb[37].mxu1  ;;  %1537 = vmatmul.mubr.bf16.gmra.mrb[84].mxu1 %v706_v35 }
 0x13f   :  { %v429_v40 = vadd.f32 %v428_v38, %v1906_v7  ;;  %v430_v41 = vpop.f32.mrb[38].mxu0  ;;  %1014 = vmatprep.mubr.bf16.mxu0 %v705_v34  ;;  %v574_v46 = vpop.f32.mrb[38].mxu1  ;;  %1540 = vmatprep.mubr.msk.bf16.mxu1 %vm1630_vm0, %v1628_v1 }
 0x140   :  { %v431_v44 = vadd.f32 %v430_v41, %v1904_v6  ;;  %v432_v45 = vpop.f32.mrb[39].mxu0  ;;  %1015 = vmatmul.mubr.bf16.gmra.mrb[84].mxu0 %v704_v33  ;;  %v658_v47 = vmax.f32 %v572_v42, 0.0  ;;  %v575_v49 = vadd.f32 %v574_v46, %v1908_v8  ;;  %v1475_v50 = vpop.f32.mrb[39].mxu1  ;;  %v656_v51 = vmax.f32 %v427_v37, 0.0 }
 0x141   :  { %v433_v48 = vadd.f32 %v432_v45, %v1906_v7  ;;  %v657_v53 = vmax.f32 %v429_v40, 0.0 }
 0x142   :  { %v659_v52 = vmax.f32 %v431_v44, 0.0  ;;  %v661_v55 = vmax.f32 %v575_v49, 0.0 }
 0x143   :  { %v660_v54 = vmax.f32 %v433_v48, 0.0 }
 0x144   :  { %v707_v56 = vpack.c.bf16 %v659_v52, %v656_v51  ;;  %v709_v58 = vpack.c.bf16 %v661_v55, %v658_v47 }
 0x145   :  { %v708_v57 = vpack.c.bf16 %v660_v54, %v657_v53  ;;  %v436_v59 = vpop.f32.mrb[40].mxu0  ;;  %v579_v62 = vpop.f32.mrb[40].mxu1 }
 0x146   :  { %v437_v60 = vadd.f32 %v436_v59, %v1904_v6  ;;  %v438_v61 = vpop.f32.mrb[41].mxu0  ;;  %v580_v2 = vadd.f32 %v579_v62, %v1908_v8  ;;  %v1478_v3 = vpop.f32.mrb[41].mxu1  ;;  %1541 = vmatmul.mubr.bf16.gmra.mrb[88].mxu1 %v709_v58 }
 0x147   :  { %v439_v63 = vadd.f32 %v438_v61, %v1906_v7  ;;  %v440_v0 = vpop.f32.mrb[42].mxu0  ;;  %1022 = vmatprep.mubr.bf16.mxu0 %v708_v57  ;;  %v582_v9 = vpop.f32.mrb[42].mxu1  ;;  %1544 = vmatprep.mubr.msk.bf16.mxu1 %vm1630_vm0, %v1628_v1 }
 0x148   :  { %v441_v4 = vadd.f32 %v440_v0, %v1904_v6  ;;  %v442_v5 = vpop.f32.mrb[43].mxu0  ;;  %1023 = vmatmul.mubr.bf16.gmra.mrb[88].mxu0 %v707_v56  ;;  %v664_v10 = vmax.f32 %v580_v2, 0.0  ;;  %v583_v12 = vadd.f32 %v582_v9, %v1908_v8  ;;  %v1479_v13 = vpop.f32.mrb[43].mxu1  ;;  %v662_v14 = vmax.f32 %v437_v60, 0.0 }
 0x149   :  { %v443_v11 = vadd.f32 %v442_v5, %v1906_v7  ;;  %v663_v16 = vmax.f32 %v439_v63, 0.0 }
 0x14a   :  { %v665_v15 = vmax.f32 %v441_v4, 0.0  ;;  %v667_v18 = vmax.f32 %v583_v12, 0.0 }
 0x14b   :  { %v666_v17 = vmax.f32 %v443_v11, 0.0 }
 0x14c   :  { %v710_v19 = vpack.c.bf16 %v665_v15, %v662_v14  ;;  %v712_v21 = vpack.c.bf16 %v667_v18, %v664_v10 }
 0x14d   :  { %v711_v20 = vpack.c.bf16 %v666_v17, %v663_v16  ;;  %v446_v22 = vpop.f32.mrb[44].mxu0  ;;  %v587_v25 = vpop.f32.mrb[44].mxu1 }
 0x14e   :  { %v447_v23 = vadd.f32 %v446_v22, %v1904_v6  ;;  %v448_v24 = vpop.f32.mrb[45].mxu0  ;;  %v588_v28 = vadd.f32 %v587_v25, %v1908_v8  ;;  %v1482_v29 = vpop.f32.mrb[45].mxu1  ;;  %1545 = vmatmul.mubr.bf16.gmra.mrb[92].mxu1 %v712_v21 }
 0x14f   :  { %v449_v26 = vadd.f32 %v448_v24, %v1906_v7  ;;  %v450_v27 = vpop.f32.mrb[46].mxu0  ;;  %1030 = vmatprep.mubr.bf16.mxu0 %v711_v20  ;;  %v590_v32 = vpop.f32.mrb[46].mxu1  ;;  %1548 = vmatprep.mubr.msk.bf16.mxu1 %vm1630_vm0, %v1628_v1 }
 0x150   :  { %v451_v30 = vadd.f32 %v450_v27, %v1904_v6  ;;  %v452_v31 = vpop.f32.mrb[47].mxu0  ;;  %1031 = vmatmul.mubr.bf16.gmra.mrb[92].mxu0 %v710_v19  ;;  %v670_v33 = vmax.f32 %v588_v28, 0.0  ;;  %v591_v35 = vadd.f32 %v590_v32, %v1908_v8  ;;  %v1483_v36 = vpop.f32.mrb[47].mxu1  ;;  %v668_v37 = vmax.f32 %v447_v23, 0.0 }
 0x151   :  { %v453_v34 = vadd.f32 %v452_v31, %v1906_v7  ;;  %v669_v39 = vmax.f32 %v449_v26, 0.0 }
 0x152   :  { %v671_v38 = vmax.f32 %v451_v30, 0.0  ;;  %v673_v41 = vmax.f32 %v591_v35, 0.0 }
 0x153   :  { %v672_v40 = vmax.f32 %v453_v34, 0.0 }
 0x154   :  { %v713_v42 = vpack.c.bf16 %v671_v38, %v668_v37  ;;  %v715_v44 = vpack.c.bf16 %v673_v41, %v670_v33 }
 0x155   :  { %v714_v43 = vpack.c.bf16 %v672_v40, %v669_v39  ;;  %v456_v45 = vpop.f32.mrb[48].mxu0  ;;  %v595_v48 = vpop.f32.mrb[48].mxu1 }
 0x156   :  { %v457_v46 = vadd.f32 %v456_v45, %v1904_v6  ;;  %v458_v47 = vpop.f32.mrb[49].mxu0  ;;  %v596_v51 = vadd.f32 %v595_v48, %v1908_v8  ;;  %v1486_v52 = vpop.f32.mrb[49].mxu1  ;;  %1549 = vmatmul.mubr.bf16.gmra.mrb[96].mxu1 %v715_v44 }
 0x157   :  { %v459_v49 = vadd.f32 %v458_v47, %v1906_v7  ;;  %v460_v50 = vpop.f32.mrb[50].mxu0  ;;  %1038 = vmatprep.mubr.bf16.mxu0 %v714_v43  ;;  %v598_v55 = vpop.f32.mrb[50].mxu1  ;;  %1552 = vmatprep.mubr.msk.bf16.mxu1 %vm1630_vm0, %v1628_v1 }
 0x158   :  { %v461_v53 = vadd.f32 %v460_v50, %v1904_v6  ;;  %v462_v54 = vpop.f32.mrb[51].mxu0  ;;  %1039 = vmatmul.mubr.bf16.gmra.mrb[96].mxu0 %v713_v42  ;;  %v676_v56 = vmax.f32 %v596_v51, 0.0  ;;  %v599_v58 = vadd.f32 %v598_v55, %v1908_v8  ;;  %v1487_v59 = vpop.f32.mrb[51].mxu1  ;;  %v674_v60 = vmax.f32 %v457_v46, 0.0 }
 0x159   :  { %v463_v57 = vadd.f32 %v462_v54, %v1906_v7  ;;  %v675_v62 = vmax.f32 %v459_v49, 0.0  ;;  %v2015_v7 = vld [vmem:[%s2125_s4] ss:$0 sm:$0xff] }
 0x15a   :  { %v677_v61 = vmax.f32 %v461_v53, 0.0  ;;  %v679_v0 = vmax.f32 %v599_v58, 0.0 }
 0x15b   :  { %v678_v63 = vmax.f32 %v463_v57, 0.0 }
 0x15c   :  { %v716_v2 = vpack.c.bf16 %v677_v61, %v674_v60  ;;  %v718_v6 = vpack.c.bf16 %v679_v0, %v676_v56 }
 0x15d   :  { %v717_v3 = vpack.c.bf16 %v678_v63, %v675_v62 }
 0x15e   :  { %1553 = vmatmul.mubr.bf16.gmra.mrb[100].mxu1 %v718_v6 }
 0x15f   :  { %1046 = vmatprep.mubr.bf16.mxu0 %v717_v3 }
 0x160   :  { %1047 = vmatmul.mubr.bf16.gmra.mrb[100].mxu0 %v716_v2 }
 0x1d1   :  { %v1089_v4 = vpop.f32.mrb[52].mxu1 }
 0x1d2   :  { %v1506_v1 = vpop.f32.mrb[53].mxu1 }
 0x1d3   :  { %v1321_v5 = vpop.f32.mrb[52].mxu0  ;;  %v1092_v9 = vpop.f32.mrb[54].mxu1 }
 0x1d4   :  { %v1322_v8 = vpop.f32.mrb[53].mxu0  ;;  %v1507_v12 = vpop.f32.mrb[55].mxu1 }
 0x1d5   :  { %v1323_v10 = vadd.f32 %v1322_v8, %v1321_v5  ;;  %v1324_v11 = vpop.f32.mrb[54].mxu0 }
 0x1d6   :  { %v1325_v13 = vpop.f32.mrb[55].mxu0 }
 0x1d7   :  { %v953_v14 = vadd.f32 %v1323_v10, %v2015_v7  ;;  %v1326_v15 = vadd.f32 %v1325_v13, %v1324_v11 }
 0x1d9   :  { %v1090_v16 = vadd.f32 %v1089_v4, %v953_v14  ;;  %v956_v17 = vadd.f32 %v1326_v15, %v2015_v7  ;;  %v1097_v18 = vpop.f32.mrb[56].mxu1 }
 0x1da   :  { %v1510_v21 = vpop.f32.mrb[57].mxu1 }
 0x1db   :  { %1192 = vst [vmem:[%s2126_s5] sm:$0xff] %v1090_v16  ;;  %v1093_v19 = vadd.f32 %v1092_v9, %v956_v17  ;;  %v1327_v20 = vpop.f32.mrb[56].mxu0  ;;  %v1100_v23 = vpop.f32.mrb[58].mxu1 }
 0x1dc   :  { %v1328_v22 = vpop.f32.mrb[57].mxu0  ;;  %v1511_v26 = vpop.f32.mrb[59].mxu1 }
 0x1dd   :  { %1193 = vst [vmem:[%s2126_s5 + $0x8] sm:$0xff] %v1093_v19  ;;  %v1329_v24 = vadd.f32 %v1328_v22, %v1327_v20  ;;  %v1330_v25 = vpop.f32.mrb[58].mxu0 }
 0x1de   :  { %v1331_v27 = vpop.f32.mrb[59].mxu0 }
 0x1df   :  { %v961_v28 = vadd.f32 %v1329_v24, %v2015_v7  ;;  %v1332_v29 = vadd.f32 %v1331_v27, %v1330_v25 }
 0x1e1   :  { %v1098_v30 = vadd.f32 %v1097_v18, %v961_v28  ;;  %v964_v31 = vadd.f32 %v1332_v29, %v2015_v7  ;;  %v1105_v32 = vpop.f32.mrb[60].mxu1 }
 0x1e2   :  { %v1514_v35 = vpop.f32.mrb[61].mxu1 }
 0x1e3   :  { %1194 = vst [vmem:[%s2126_s5 + $0x10] sm:$0xff] %v1098_v30  ;;  %v1101_v33 = vadd.f32 %v1100_v23, %v964_v31  ;;  %v1333_v34 = vpop.f32.mrb[60].mxu0  ;;  %v1108_v37 = vpop.f32.mrb[62].mxu1 }
 0x1e4   :  { %v1334_v36 = vpop.f32.mrb[61].mxu0  ;;  %v1515_v40 = vpop.f32.mrb[63].mxu1 }
 0x1e5   :  { %1195 = vst [vmem:[%s2126_s5 + $0x18] sm:$0xff] %v1101_v33  ;;  %v1335_v38 = vadd.f32 %v1334_v36, %v1333_v34  ;;  %v1336_v39 = vpop.f32.mrb[62].mxu0 }
 0x1e6   :  { %v1337_v41 = vpop.f32.mrb[63].mxu0 }
 0x1e7   :  { %v969_v42 = vadd.f32 %v1335_v38, %v2015_v7  ;;  %v1338_v43 = vadd.f32 %v1337_v41, %v1336_v39 }
 0x1e9   :  { %v1106_v44 = vadd.f32 %v1105_v32, %v969_v42  ;;  %v972_v45 = vadd.f32 %v1338_v43, %v2015_v7  ;;  %v1113_v46 = vpop.f32.mrb[64].mxu1 }
 0x1ea   :  { %v1518_v49 = vpop.f32.mrb[65].mxu1 }
 0x1eb   :  { %1196 = vst [vmem:[%s2126_s5 + $0x20] sm:$0xff] %v1106_v44  ;;  %v1109_v47 = vadd.f32 %v1108_v37, %v972_v45  ;;  %v1339_v48 = vpop.f32.mrb[64].mxu0  ;;  %v1116_v51 = vpop.f32.mrb[66].mxu1 }
 0x1ec   :  { %v1340_v50 = vpop.f32.mrb[65].mxu0  ;;  %v1519_v54 = vpop.f32.mrb[67].mxu1 }
 0x1ed   :  { %1197 = vst [vmem:[%s2126_s5 + $0x28] sm:$0xff] %v1109_v47  ;;  %v1341_v52 = vadd.f32 %v1340_v50, %v1339_v48  ;;  %v1342_v53 = vpop.f32.mrb[66].mxu0 }
 0x1ee   :  { %v1343_v55 = vpop.f32.mrb[67].mxu0 }
 0x1ef   :  { %v977_v56 = vadd.f32 %v1341_v52, %v2015_v7  ;;  %v1344_v57 = vadd.f32 %v1343_v55, %v1342_v53 }
 0x1f1   :  { %v1114_v58 = vadd.f32 %v1113_v46, %v977_v56  ;;  %v980_v59 = vadd.f32 %v1344_v57, %v2015_v7  ;;  %v1121_v60 = vpop.f32.mrb[68].mxu1 }
 0x1f2   :  { %v1522_v63 = vpop.f32.mrb[69].mxu1 }
 0x1f3   :  { %1198 = vst [vmem:[%s2126_s5 + $0x30] sm:$0xff] %v1114_v58  ;;  %v1117_v61 = vadd.f32 %v1116_v51, %v980_v59  ;;  %v1345_v62 = vpop.f32.mrb[68].mxu0  ;;  %v1124_v2 = vpop.f32.mrb[70].mxu1 }
 0x1f4   :  { %v1346_v0 = vpop.f32.mrb[69].mxu0  ;;  %v1523_v4 = vpop.f32.mrb[71].mxu1 }
 0x1f5   :  { %1199 = vst [vmem:[%s2126_s5 + $0x38] sm:$0xff] %v1117_v61  ;;  %v1347_v3 = vadd.f32 %v1346_v0, %v1345_v62  ;;  %v1348_v6 = vpop.f32.mrb[70].mxu0 }
 0x1f6   :  { %v1349_v5 = vpop.f32.mrb[71].mxu0 }
 0x1f7   :  { %v985_v1 = vadd.f32 %v1347_v3, %v2015_v7  ;;  %v1350_v8 = vadd.f32 %v1349_v5, %v1348_v6 }
 0x1f9   :  { %v1122_v9 = vadd.f32 %v1121_v60, %v985_v1  ;;  %v988_v10 = vadd.f32 %v1350_v8, %v2015_v7  ;;  %v1129_v11 = vpop.f32.mrb[72].mxu1 }
 0x1fa   :  { %v1526_v14 = vpop.f32.mrb[73].mxu1 }
 0x1fb   :  { %1200 = vst [vmem:[%s2126_s5 + $0x40] sm:$0xff] %v1122_v9  ;;  %v1125_v12 = vadd.f32 %v1124_v2, %v988_v10  ;;  %v1351_v13 = vpop.f32.mrb[72].mxu0  ;;  %v1132_v16 = vpop.f32.mrb[74].mxu1 }
 0x1fc   :  { %v1352_v15 = vpop.f32.mrb[73].mxu0  ;;  %v1527_v19 = vpop.f32.mrb[75].mxu1 }
 0x1fd   :  { %1201 = vst [vmem:[%s2126_s5 + $0x48] sm:$0xff] %v1125_v12  ;;  %v1353_v17 = vadd.f32 %v1352_v15, %v1351_v13  ;;  %v1354_v18 = vpop.f32.mrb[74].mxu0 }
 0x1fe   :  { %v1355_v20 = vpop.f32.mrb[75].mxu0 }
 0x1ff   :  { %v993_v21 = vadd.f32 %v1353_v17, %v2015_v7  ;;  %v1356_v22 = vadd.f32 %v1355_v20, %v1354_v18 }
 0x201   :  { %v1130_v23 = vadd.f32 %v1129_v11, %v993_v21  ;;  %v996_v24 = vadd.f32 %v1356_v22, %v2015_v7  ;;  %v1137_v25 = vpop.f32.mrb[76].mxu1 }
 0x202   :  { %v1530_v28 = vpop.f32.mrb[77].mxu1 }
 0x203   :  { %1202 = vst [vmem:[%s2126_s5 + $0x50] sm:$0xff] %v1130_v23  ;;  %v1133_v26 = vadd.f32 %v1132_v16, %v996_v24  ;;  %v1357_v27 = vpop.f32.mrb[76].mxu0  ;;  %v1140_v30 = vpop.f32.mrb[78].mxu1 }
 0x204   :  { %v1358_v29 = vpop.f32.mrb[77].mxu0  ;;  %v1531_v33 = vpop.f32.mrb[79].mxu1 }
 0x205   :  { %1203 = vst [vmem:[%s2126_s5 + $0x58] sm:$0xff] %v1133_v26  ;;  %v1359_v31 = vadd.f32 %v1358_v29, %v1357_v27  ;;  %v1360_v32 = vpop.f32.mrb[78].mxu0 }
 0x206   :  { %v1361_v34 = vpop.f32.mrb[79].mxu0 }
 0x207   :  { %v1001_v35 = vadd.f32 %v1359_v31, %v2015_v7  ;;  %v1362_v36 = vadd.f32 %v1361_v34, %v1360_v32 }
 0x209   :  { %v1138_v37 = vadd.f32 %v1137_v25, %v1001_v35  ;;  %v1004_v38 = vadd.f32 %v1362_v36, %v2015_v7  ;;  %v1145_v39 = vpop.f32.mrb[80].mxu1 }
 0x20a   :  { %v1534_v42 = vpop.f32.mrb[81].mxu1 }
 0x20b   :  { %1204 = vst [vmem:[%s2126_s5 + $0x60] sm:$0xff] %v1138_v37  ;;  %v1141_v40 = vadd.f32 %v1140_v30, %v1004_v38  ;;  %v1363_v41 = vpop.f32.mrb[80].mxu0  ;;  %v1148_v44 = vpop.f32.mrb[82].mxu1 }
 0x20c   :  { %v1364_v43 = vpop.f32.mrb[81].mxu0  ;;  %v1535_v47 = vpop.f32.mrb[83].mxu1 }
 0x20d   :  { %1205 = vst [vmem:[%s2126_s5 + $0x68] sm:$0xff] %v1141_v40  ;;  %v1365_v45 = vadd.f32 %v1364_v43, %v1363_v41  ;;  %v1366_v46 = vpop.f32.mrb[82].mxu0 }
 0x20e   :  { %v1367_v48 = vpop.f32.mrb[83].mxu0 }
 0x20f   :  { %v1009_v49 = vadd.f32 %v1365_v45, %v2015_v7  ;;  %v1368_v50 = vadd.f32 %v1367_v48, %v1366_v46 }
 0x211   :  { %v1146_v51 = vadd.f32 %v1145_v39, %v1009_v49  ;;  %v1012_v52 = vadd.f32 %v1368_v50, %v2015_v7  ;;  %v1153_v53 = vpop.f32.mrb[84].mxu1 }
 0x212   :  { %v1538_v56 = vpop.f32.mrb[85].mxu1 }
 0x213   :  { %1206 = vst [vmem:[%s2126_s5 + $0x70] sm:$0xff] %v1146_v51  ;;  %v1149_v54 = vadd.f32 %v1148_v44, %v1012_v52  ;;  %v1369_v55 = vpop.f32.mrb[84].mxu0  ;;  %v1156_v58 = vpop.f32.mrb[86].mxu1 }
 0x214   :  { %v1370_v57 = vpop.f32.mrb[85].mxu0  ;;  %v1539_v61 = vpop.f32.mrb[87].mxu1 }
 0x215   :  { %1207 = vst [vmem:[%s2126_s5 + $0x78] sm:$0xff] %v1149_v54  ;;  %v1371_v59 = vadd.f32 %v1370_v57, %v1369_v55  ;;  %v1372_v60 = vpop.f32.mrb[86].mxu0 }
 0x216   :  { %v1373_v62 = vpop.f32.mrb[87].mxu0 }
 0x217   :  { %v1017_v63 = vadd.f32 %v1371_v59, %v2015_v7  ;;  %v1374_v0 = vadd.f32 %v1373_v62, %v1372_v60 }
 0x219   :  { %v1154_v2 = vadd.f32 %v1153_v53, %v1017_v63  ;;  %v1020_v3 = vadd.f32 %v1374_v0, %v2015_v7  ;;  %v1161_v6 = vpop.f32.mrb[88].mxu1 }
 0x21a   :  { %v1542_v1 = vpop.f32.mrb[89].mxu1 }
 0x21b   :  { %1208 = vst [vmem:[%s2126_s5 + $0x80] sm:$0xff] %v1154_v2  ;;  %v1157_v4 = vadd.f32 %v1156_v58, %v1020_v3  ;;  %v1375_v5 = vpop.f32.mrb[88].mxu0  ;;  %v1164_v9 = vpop.f32.mrb[90].mxu1 }
 0x21c   :  { %v1376_v8 = vpop.f32.mrb[89].mxu0  ;;  %v1543_v12 = vpop.f32.mrb[91].mxu1 }
 0x21d   :  { %1209 = vst [vmem:[%s2126_s5 + $0x88] sm:$0xff] %v1157_v4  ;;  %v1377_v10 = vadd.f32 %v1376_v8, %v1375_v5  ;;  %v1378_v11 = vpop.f32.mrb[90].mxu0 }
 0x21e   :  { %v1379_v13 = vpop.f32.mrb[91].mxu0 }
 0x21f   :  { %v1025_v14 = vadd.f32 %v1377_v10, %v2015_v7  ;;  %v1380_v15 = vadd.f32 %v1379_v13, %v1378_v11 }
 0x221   :  { %v1162_v16 = vadd.f32 %v1161_v6, %v1025_v14  ;;  %v1028_v17 = vadd.f32 %v1380_v15, %v2015_v7  ;;  %v1169_v18 = vpop.f32.mrb[92].mxu1 }
 0x222   :  { %v1546_v21 = vpop.f32.mrb[93].mxu1 }
 0x223   :  { %1210 = vst [vmem:[%s2126_s5 + $0x90] sm:$0xff] %v1162_v16  ;;  %v1165_v19 = vadd.f32 %v1164_v9, %v1028_v17  ;;  %v1381_v20 = vpop.f32.mrb[92].mxu0  ;;  %v1172_v23 = vpop.f32.mrb[94].mxu1 }
 0x224   :  { %v1382_v22 = vpop.f32.mrb[93].mxu0  ;;  %v1547_v26 = vpop.f32.mrb[95].mxu1 }
 0x225   :  { %1211 = vst [vmem:[%s2126_s5 + $0x98] sm:$0xff] %v1165_v19  ;;  %v1383_v24 = vadd.f32 %v1382_v22, %v1381_v20  ;;  %v1384_v25 = vpop.f32.mrb[94].mxu0 }
 0x226   :  { %v1385_v27 = vpop.f32.mrb[95].mxu0 }
 0x227   :  { %v1033_v28 = vadd.f32 %v1383_v24, %v2015_v7  ;;  %v1386_v29 = vadd.f32 %v1385_v27, %v1384_v25 }
 0x229   :  { %v1170_v30 = vadd.f32 %v1169_v18, %v1033_v28  ;;  %v1036_v31 = vadd.f32 %v1386_v29, %v2015_v7  ;;  %v1177_v32 = vpop.f32.mrb[96].mxu1 }
 0x22a   :  { %v1550_v35 = vpop.f32.mrb[97].mxu1 }
 0x22b   :  { %1212 = vst [vmem:[%s2126_s5 + $0xa0] sm:$0xff] %v1170_v30  ;;  %v1173_v33 = vadd.f32 %v1172_v23, %v1036_v31  ;;  %v1387_v34 = vpop.f32.mrb[96].mxu0  ;;  %v1180_v37 = vpop.f32.mrb[98].mxu1 }
 0x22c   :  { %v1388_v36 = vpop.f32.mrb[97].mxu0  ;;  %v1551_v40 = vpop.f32.mrb[99].mxu1 }
 0x22d   :  { %1213 = vst [vmem:[%s2126_s5 + $0xa8] sm:$0xff] %v1173_v33  ;;  %v1389_v38 = vadd.f32 %v1388_v36, %v1387_v34  ;;  %v1390_v39 = vpop.f32.mrb[98].mxu0 }
 0x22e   :  { %v1391_v41 = vpop.f32.mrb[99].mxu0 }
 0x22f   :  { %v1041_v42 = vadd.f32 %v1389_v38, %v2015_v7  ;;  %v1392_v43 = vadd.f32 %v1391_v41, %v1390_v39 }
 0x231   :  { %v1178_v44 = vadd.f32 %v1177_v32, %v1041_v42  ;;  %v1044_v45 = vadd.f32 %v1392_v43, %v2015_v7  ;;  %v1185_v46 = vpop.f32.mrb[100].mxu1 }
 0x232   :  { %v1554_v49 = vpop.f32.mrb[101].mxu1 }
 0x233   :  { %1214 = vst [vmem:[%s2126_s5 + $0xb0] sm:$0xff] %v1178_v44  ;;  %v1181_v47 = vadd.f32 %v1180_v37, %v1044_v45  ;;  %v1393_v48 = vpop.f32.mrb[100].mxu0  ;;  %v1188_v51 = vpop.f32.mrb[102].mxu1 }
 0x234   :  { %v1394_v50 = vpop.f32.mrb[101].mxu0  ;;  %v1555_v54 = vpop.f32.mrb[103].mxu1 }
 0x235   :  { %1215 = vst [vmem:[%s2126_s5 + $0xb8] sm:$0xff] %v1181_v47  ;;  %v1395_v52 = vadd.f32 %v1394_v50, %v1393_v48  ;;  %v1396_v53 = vpop.f32.mrb[102].mxu0 }
 0x236   :  { %v1397_v55 = vpop.f32.mrb[103].mxu0 }
 0x237   :  { %v1049_v56 = vadd.f32 %v1395_v52, %v2015_v7  ;;  %v1398_v57 = vadd.f32 %v1397_v55, %v1396_v53 }
 0x239   :  { %v1186_v58 = vadd.f32 %v1185_v46, %v1049_v56  ;;  %v1052_v59 = vadd.f32 %v1398_v57, %v2015_v7 }
 0x23b   :  { %1216 = vst [vmem:[%s2126_s5 + $0xc0] sm:$0xff] %v1186_v58  ;;  %v1189_v60 = vadd.f32 %v1188_v51, %v1052_v59 }
 0x23d   :  { %1217 = vst [vmem:[%s2126_s5 + $0xc8] sm:$0xff] %v1189_v60 }

</bundles_post_ra>
